<compile_context>
chip_gen: v7x
topology: tpu7x:2x2x1
jax: 0.10.0
libtpu: 0.0.40
codegen_flags: <defaults>
</compile_context>

<pallas_src>
import math

import jax
import jax.numpy as jnp
import numpy as np
from jax.experimental import pallas as pl
from jax.experimental.pallas import tpu as pltpu

LANE = 128
SUBLANE = 8


def _ceil_to(n, m):
    return ((n + m - 1) // m) * m


def _pad_cols(x, to):
    pad = to - x.shape[-1]
    if pad <= 0:
        return x
    return jnp.pad(x, [(0, 0)] * (x.ndim - 1) + [(0, pad)])


def _pad_rows(x, to):
    pad = to - x.shape[0]
    if pad <= 0:
        return x
    return jnp.pad(x, [(0, pad)] + [(0, 0)] * (x.ndim - 1))


# ------------------------------ fused kernel ---------------------------------

def vqa_kernel(qb_ref,       # VMEM (L*B, 2) int32  col0 = token id, col1 = batch id
               patch_ref,    # VMEM (B*Npad, K) f32 patch rows; cls/pad rows are zero
               w_ref,        # VMEM (K, Ep) f32     conv-as-matmul weight (E zero-padded)
               addend_ref,   # VMEM (Npad, Ep) f32  [cls+pos0; bias+pos[1:]; zeros]
               emb_ref,      # VMEM (Vp, Dp) f32    emb_table * sqrt(dim_model), row-padded
               posq_ref,     # VMEM (Bp, Dp) f32    pos_encoding[:B], row-padded
               img_out_ref,  # VMEM (B, Npad, Ep) f32
               qst_out_ref): # VMEM (L*B, Dp) f32   row l*B + b  <->  [l, b]
    B, Npad, Ep = img_out_ref.shape
    LB = qst_out_ref.shape[0]
    Vp = emb_ref.shape[0]
    Bp = posq_ref.shape[0]

    # ---- image path: one matmul, one broadcast add, one dense aligned store ----
    # Zero patch rows (cls slot / sublane pad) project to exact zeros, so the
    # folded additive constant supplies cls+pos[0] for row 0 and bias+pos for
    # the body rows; pad rows stay zero and are sliced off by the wrapper.
    x = jnp.dot(patch_ref[...], w_ref[...],
                preferred_element_type=jnp.float32)               # (B*Npad, Ep)
    img_out_ref[...] = (x.reshape(B, Npad, Ep)
                        + addend_ref[...][None, :, :]).astype(img_out_ref.dtype)

    # ---- question path: one-hot selection via two tiny matmuls, one store ----
    # One-hot row selection on the MXU is exact (1*x + 0*y sums), so this
    # matches the f32 reference bit-for-bit.  Out-of-range ids -> zero row.
    qb = qb_ref[...]                                              # (LB, 2) int32
    tok = qb[:, 0:1]                                              # (LB, 1)
    bid = qb[:, 1:2]                                              # (LB, 1)
    one = jnp.float32(1.0)
    zero = jnp.float32(0.0)
    oh_tok = jnp.where(tok == jax.lax.broadcasted_iota(jnp.int32, (LB, Vp), 1),
                       one, zero)                                 # (LB, Vp)
    oh_bat = jnp.where(bid == jax.lax.broadcasted_iota(jnp.int32, (LB, Bp), 1),
                       one, zero)                                 # (LB, Bp)
    q = (jnp.dot(oh_tok, emb_ref[...], preferred_element_type=jnp.float32)
         + jnp.dot(oh_bat, posq_ref[...], preferred_element_type=jnp.float32))
    qst_out_ref[...] = q.astype(qst_out_ref.dtype)                # dense (LB, Dp)


def vqa_pallas(qb, patches, w, addend, emb, posq, b, n_pad, e_pad, d_pad, lb):
    out_shapes = (
        jax.ShapeDtypeStruct((b, n_pad, e_pad), jnp.float32),
        jax.ShapeDtypeStruct((lb, d_pad), jnp.float32),
    )
    vmem = pl.BlockSpec(memory_space=pltpu.MemorySpace.VMEM)
    # Single invocation (no grid): at these shapes everything fits in VMEM and
    # one fused call avoids per-step pipeline overhead.
    # TODO(synk): for real ViT sizes, tile B*Npad rows with a ("parallel",)
    # grid axis (megacore on v7x) and size the tiles for v7x's 64 MiB VMEM
    # (set vmem_limit_bytes explicitly; roughly half the v6e tile).
    return pl.pallas_call(
        vqa_kernel,
        out_shape=out_shapes,
        in_specs=[vmem] * 6,
        out_specs=(vmem, vmem),
    )(qb, patches, w, addend, emb, posq)


# --------------------------- one-time preprocessing ----------------------------

def make_pos_encoding(max_len, dim_model):
    # Same formula as PositionalEncoding.__init__ -> shape (max_len, 1, D)
    pos = np.zeros((max_len, dim_model), dtype=np.float32)
    position_list = np.arange(0, max_len, dtype=np.float32).reshape(-1, 1)
    division_term = np.exp(np.arange(0, dim_model, 2, dtype=np.float32)
                           * (-math.log(10000.0) / dim_model))
    pos[:, 0::2] = np.sin(position_list * division_term)
    pos[:, 1::2] = np.cos(position_list * division_term)
    return jnp.asarray(pos[:, None, :])           # (max_len, 1, D)


def prepare_vqa_params(params):
    """One-time parameter preprocessing (lane padding + constant folding).

    Done once, NOT per forward call, so no per-call XLA padding passes.
    """
    P = params["patch_size"]
    conv_w = params["conv_w_mat"]                  # (K, E)
    K, E = conv_w.shape
    n_plus_1 = params["positions"].shape[0]        # N + 1
    N = n_plus_1 - 1
    V, D = params["emb_table"].shape
    Ep = _ceil_to(E, LANE)
    Dp = _ceil_to(D, LANE)
    Npad = _ceil_to(N + 1, SUBLANE)
    Vp = _ceil_to(V, SUBLANE)

    w_p = _pad_cols(conv_w, Ep)                                        # (K, Ep)
    # Fused per-row additive constant: row 0 = cls + pos[0] (cls patch row is
    # zero, so no bias there), rows 1..N = conv bias + pos[1:], tail = 0.
    addend = jnp.concatenate([
        params["cls_token"] + params["positions"][0:1],
        params["conv_b"] + params["positions"][1:],
        jnp.zeros((Npad - (N + 1), E), jnp.float32),
    ], axis=0)
    addend_p = _pad_cols(addend, Ep)                                   # (Npad, Ep)
    emb_p = _pad_rows(_pad_cols(params["emb_table"] * math.sqrt(D), Dp), Vp)
    pos_enc_p = _pad_cols(params["pos_encoding"][:, 0, :], Dp)         # (max_len, Dp)

    return dict(patch_size=P, n_patches=N, n_pad=Npad, emb_size=E,
                dim_model=D, e_pad=Ep, d_pad=Dp, v_pad=Vp,
                w=w_p, img_addend=addend_p, emb=emb_p, pos_enc=pos_enc_p)


# --------------------------------- wrapper -------------------------------------

def extract_patches_padded(img, patch_size, n_pad):
    # img (B, C, H, W) NCHW -> (B*Npad, C*P*P); per-batch row 0 (cls slot) and
    # the sublane-pad tail rows are zero.  Features flattened (c, i, j) to
    # match Conv2d(kernel=stride=P) weights.
    # TODO(synk): for real image sizes, express this patch read via a BlockSpec
    # index_map over (b, h, w) instead of an XLA transpose/pad pre-pass.
    B, C, H, W = img.shape
    P = patch_size
    h, w = H // P, W // P
    x = img.reshape(B, C, h, P, w, P)
    x = jnp.transpose(x, (0, 2, 4, 1, 3, 5)).reshape(B, h * w, C * P * P)
    x = jnp.pad(x, ((0, 0), (1, n_pad - h * w - 1), (0, 0)))
    return x.reshape(B * n_pad, C * P * P)


def vqa_model_forward(img, qst, prepped):
    B = img.shape[0]
    L = qst.shape[1]
    N, Npad = prepped["n_patches"], prepped["n_pad"]
    E, D = prepped["emb_size"], prepped["dim_model"]
    Ep, Dp = prepped["e_pad"], prepped["d_pad"]
    Bp = _ceil_to(B, SUBLANE)
    LB = L * B

    patches = extract_patches_padded(img, prepped["patch_size"], Npad)  # (B*Npad, K)
    # Question index columns: output row l*B + b holds (token qst[b,l], batch b).
    tok_col = jnp.transpose(qst).reshape(LB, 1)
    bat_col = jnp.tile(jnp.arange(B, dtype=jnp.int32), L).reshape(LB, 1)
    qb = jnp.concatenate([tok_col, bat_col], axis=1).astype(jnp.int32)  # (LB, 2)
    # PyTorch quirk (kept on purpose): PositionalEncoding is indexed by the
    # *batch* dimension (token_embedding.size(0) == B) and broadcast over L.
    posq = _pad_rows(prepped["pos_enc"][:B], Bp)                        # (Bp, Dp)

    img_flat, qst_flat = vqa_pallas(qb, patches, prepped["w"],
                                    prepped["img_addend"], prepped["emb"],
                                    posq, B, Npad, Ep, Dp, LB)
    img_feature = img_flat[:, :N + 1, :E]                               # (B, N+1, E)
    qst_feature = qst_flat.reshape(L, B, Dp)[:, :, :D]                  # (L, B, D)
    # TODO(synk): nn.Dropout(p) is identity in eval mode; train-mode dropout
    # (random masking) is intentionally not applied here.
    return img_feature, qst_feature


# ------------------------------- reference -------------------------------------

def reference_forward(img, qst, params):
    P = params["patch_size"]
    B, C, H, W = img.shape
    h, w = H // P, W // P
    E = params["conv_w_mat"].shape[1]
    x = img.reshape(B, C, h, P, w, P)
    patches = jnp.transpose(x, (0, 2, 4, 1, 3, 5)).reshape(B, h * w, C * P * P)
    proj = patches @ params["conv_w_mat"] + params["conv_b"]            # (B, N, E)
    cls = jnp.broadcast_to(params["cls_token"][None], (B, 1, E))
    img_feat = jnp.concatenate([cls, proj], axis=1) + params["positions"]
    D = params["emb_table"].shape[1]
    emb = params["emb_table"][qst] * math.sqrt(D)                       # (B, L, D)
    qst_feat = emb + params["pos_encoding"][:B]                         # (B,1,D) bcast
    return img_feat, jnp.transpose(qst_feat, (1, 0, 2))


# --------------------------------- main -----------------------------------------

if __name__ == "__main__":
    # Small config consistent with the module's constructor:
    B, C, P, IMG, E = 2, 3, 4, 16, 32          # batch, in_channel, patch, img, emb
    V, D, L = 4, 8, 8                          # num_tokens, dim_model, question len
    N = (IMG // P) ** 2                        # number of patches
    MAX_LEN = 32                               # (module uses 5000; only [:B] is read)

    key = jax.random.PRNGKey(0)
    k = jax.random.split(key, 7)

    conv_w = 0.02 * jax.random.normal(k[0], (E, C, P, P), jnp.float32)
    conv_b = 0.02 * jax.random.normal(k[1], (E,), jnp.float32)
    params = {
        "patch_size": P,
        # Conv2d(k=stride=P) as matmul: W[k, e] with k flattened as (c, i, j)
        "conv_w_mat": conv_w.reshape(E, C * P * P).T,                   # (K, E)
        "conv_b": conv_b.reshape(1, E),
        "cls_token": jax.random.normal(k[2], (1, E), jnp.float32),
        "positions": jax.random.normal(k[3], (N + 1, E), jnp.float32),
        "emb_table": jax.random.normal(k[4], (V, D), jnp.float32),
        "pos_encoding": make_pos_encoding(MAX_LEN, D),
    }
    prepped = prepare_vqa_params(params)       # one-time preprocessing

    img = jax.random.normal(k[5], (B, C, IMG, IMG), jnp.float32)
    qst = jax.random.randint(k[6], (B, L), 0, V, dtype=jnp.int32)

    img_feature, qst_feature = vqa_model_forward(img, qst, prepped)
    jax.block_until_ready((img_feature, qst_feature))

    ref_img, ref_qst = reference_forward(img, qst, params)
    assert img_feature.shape == (B, N + 1, E)
    assert qst_feature.shape == (L, B, D)
    np.testing.assert_allclose(np.asarray(img_feature), np.asarray(ref_img),
                               rtol=1e-5, atol=1e-5)
    np.testing.assert_allclose(np.asarray(qst_feature), np.asarray(ref_qst),
                               rtol=1e-5, atol=1e-5)

    print("KERNEL_OK")
</pallas_src>

<mosaic_0001>
module attributes {stable_mosaic.version = 11 : i64} {
  func.func @vqa_kernel(%arg0: memref<16x2xi32, #tpu.memory_space<vmem>>, %arg1: memref<48x48xf32, #tpu.memory_space<vmem>>, %arg2: memref<48x128xf32, #tpu.memory_space<vmem>>, %arg3: memref<24x128xf32, #tpu.memory_space<vmem>>, %arg4: memref<8x128xf32, #tpu.memory_space<vmem>>, %arg5: memref<8x128xf32, #tpu.memory_space<vmem>>, %arg6: memref<2x24x128xf32, #tpu.memory_space<vmem>>, %arg7: memref<16x128xf32, #tpu.memory_space<vmem>>) attributes {dimension_semantics = [], scalar_prefetch = 0 : i64, scratch_operands = 0 : i64, tpu.core_type = #tpu.core_type<tc>} {
    %c0 = arith.constant 0 : index
    %c0_0 = arith.constant 0 : index
    %0 = vector.load %arg1[%c0, %c0_0] : memref<48x48xf32, #tpu.memory_space<vmem>>, vector<48x48xf32>
    %c0_1 = arith.constant 0 : index
    %c0_2 = arith.constant 0 : index
    %1 = vector.load %arg2[%c0_1, %c0_2] : memref<48x128xf32, #tpu.memory_space<vmem>>, vector<48x128xf32>
    %cst = arith.constant dense<0.000000e+00> : vector<48x128xf32>
    %2 = tpu.matmul %0, %1, %cst {dimension_numbers = #tpu.dot_dimension_numbers<[1], [0], [0], [1], [0, 0, 1, 1], [], []>} : vector<48x48xf32>, vector<48x128xf32>, vector<48x128xf32> -> vector<48x128xf32>
    %3 = vector.shape_cast %2 : vector<48x128xf32> to vector<2x24x128xf32>
    %c0_3 = arith.constant 0 : index
    %c0_4 = arith.constant 0 : index
    %4 = vector.load %arg3[%c0_3, %c0_4] : memref<24x128xf32, #tpu.memory_space<vmem>>, vector<24x128xf32>
    %5 = vector.shape_cast %4 : vector<24x128xf32> to vector<1x24x128xf32>
    %6 = vector.broadcast %5 : vector<1x24x128xf32> to vector<2x24x128xf32>
    %7 = arith.addf %3, %6 : vector<2x24x128xf32>
    %c0_5 = arith.constant 0 : index
    %c0_6 = arith.constant 0 : index
    %c0_7 = arith.constant 0 : index
    %8 = vector.load %arg6[%c0_5, %c0_6, %c0_7] : memref<2x24x128xf32, #tpu.memory_space<vmem>>, vector<2x24x128xf32>
    tpu.vector_store %arg6[%c0_5, %c0_6, %c0_7], %7 {strides = array<i32>} : memref<2x24x128xf32, #tpu.memory_space<vmem>>, vector<2x24x128xf32>,
    %c0_8 = arith.constant 0 : index
    %c0_9 = arith.constant 0 : index
    %9 = vector.load %arg0[%c0_8, %c0_9] : memref<16x2xi32, #tpu.memory_space<vmem>>, vector<16x2xi32>
    %10 = vector.extract_strided_slice %9 {offsets = [0, 0], sizes = [16, 1], strides = [1, 1]} : vector<16x2xi32> to vector<16x1xi32>
    %11 = vector.extract_strided_slice %9 {offsets = [0, 1], sizes = [16, 1], strides = [1, 1]} : vector<16x2xi32> to vector<16x1xi32>
    %12 = tpu.iota {dimensions = array<i32: 1>} : vector<16x8xi32>
    %13 = vector.broadcast %10 : vector<16x1xi32> to vector<16x8xi32>
    %14 = arith.cmpi eq, %13, %12 : vector<16x8xi32>
    %cst_10 = arith.constant 1.000000e+00 : f32
    %cst_11 = arith.constant 0.000000e+00 : f32
    %15 = vector.broadcast %cst_10 : f32 to vector<16x8xf32>
    %16 = vector.broadcast %cst_11 : f32 to vector<16x8xf32>
    %17 = arith.select %14, %15, %16 : vector<16x8xi1>, vector<16x8xf32>
    %18 = tpu.iota {dimensions = array<i32: 1>} : vector<16x8xi32>
    %19 = vector.broadcast %11 : vector<16x1xi32> to vector<16x8xi32>
    %20 = arith.cmpi eq, %19, %18 : vector<16x8xi32>
    %cst_12 = arith.constant 1.000000e+00 : f32
    %cst_13 = arith.constant 0.000000e+00 : f32
    %21 = vector.broadcast %cst_12 : f32 to vector<16x8xf32>
    %22 = vector.broadcast %cst_13 : f32 to vector<16x8xf32>
    %23 = arith.select %20, %21, %22 : vector<16x8xi1>, vector<16x8xf32>
    %c0_14 = arith.constant 0 : index
    %c0_15 = arith.constant 0 : index
    %24 = vector.load %arg4[%c0_14, %c0_15] : memref<8x128xf32, #tpu.memory_space<vmem>>, vector<8x128xf32>
    %cst_16 = arith.constant dense<0.000000e+00> : vector<16x128xf32>
    %25 = tpu.matmul %17, %24, %cst_16 {dimension_numbers = #tpu.dot_dimension_numbers<[1], [0], [0], [1], [0, 0, 1, 1], [], []>} : vector<16x8xf32>, vector<8x128xf32>, vector<16x128xf32> -> vector<16x128xf32>
    %c0_17 = arith.constant 0 : index
    %c0_18 = arith.constant 0 : index
    %26 = vector.load %arg5[%c0_17, %c0_18] : memref<8x128xf32, #tpu.memory_space<vmem>>, vector<8x128xf32>
    %cst_19 = arith.constant dense<0.000000e+00> : vector<16x128xf32>
    %27 = tpu.matmul %23, %26, %cst_19 {dimension_numbers = #tpu.dot_dimension_numbers<[1], [0], [0], [1], [0, 0, 1, 1], [], []>} : vector<16x8xf32>, vector<8x128xf32>, vector<16x128xf32> -> vector<16x128xf32>
    %28 = arith.addf %25, %27 : vector<16x128xf32>
    %c0_20 = arith.constant 0 : index
    %c0_21 = arith.constant 0 : index
    %29 = vector.load %arg7[%c0_20, %c0_21] : memref<16x128xf32, #tpu.memory_space<vmem>>, vector<16x128xf32>
    tpu.vector_store %arg7[%c0_20, %c0_21], %28 {strides = array<i32>} : memref<16x128xf32, #tpu.memory_space<vmem>>, vector<16x128xf32>,
    return
  }
}

</mosaic_0001>

<bundles_post_ra>
// kernel: tpu_custom_call.1
= control target key start
LH: loop header
LB: loop body
LE: loop exit
PB: predicated region body
PF: predicated region fallthrough
CT: control target
= control target key end

     0   :  { %13 = vsyncpa [#allocation3], 0  ;;  %s792_s0 = inlined_call_operand.vmem [shape: s32[16,2], index: 0, kind: input, shape index: {}]   ;;  %s793_s1 = inlined_call_operand.hbm [shape: f32[48,48], index: 1, kind: input, shape index: {}]   ;;  %s794_s2 = inlined_call_operand.hbm [shape: f32[48,128], index: 2, kind: input, shape index: {}]   ;;  %s795_s3 = inlined_call_operand.vmem [shape: f32[24,128], index: 3, kind: input, shape index: {}]   ;;  %s796_s4 = inlined_call_operand.vmem [shape: f32[8,128], index: 4, kind: input, shape index: {}]   ;;  %s797_s5 = inlined_call_operand.hbm [shape: f32[8,128], index: 5, kind: input, shape index: {}]   ;;  %s798_s6 = inlined_call_operand.hbm [shape: f32[2,24,128], index: 6, kind: output, shape index: {0}]   ;;  %s799_s7 = inlined_call_operand.hbm [shape: f32[16,128], index: 7, kind: output, shape index: {1}]  }
   0x1   :  { %14 = vsyncpa [#allocation6], 0 }
   0x2   :  { %15 = vsyncpa [#allocation4], 0 }
   0x3   :  { %16 = vsyncpa [#allocation10], 0  ;;  %s635_s24 = smov [#allocation5]   ;;  %s636_s26 = smov [#allocation2]  }
   0x4   :  { %s36_s25 = sshll.u32 %s635_s24, 4  ;;  %s24_s27 = sshll.u32 %s636_s26, 4  ;;  %s37_s25 = int_to_ptr.vmem [resolvable:$true] %s36_s25  ;;  %s685_s27 = int_to_ptr.vmem [resolvable:$true] %s24_s27 }
   0x5   :  { %s517_s30 = scalar_lea.hbm %s794_s2, 768 }
   0x6   :  { %p518_p0 = scmp.ne.s32.totalorder %s794_s2, %s517_s30  ;;  %p521_p1 = scmp.lt.u32.totalorder %s517_s30, %s794_s2 }
   0x8   :  { %p523_p2 = pnand %p521_p1, %p518_p0 }
   0xa   :  { %526 = shalt.err (!%p523_p2)
}
   0xb   :  { %s527_s12 = scalar_lea.vmem %s37_s25, 768  ;;  %p532_p4 = scmp.lt.s32.totalorder %s37_s25, %s37_s25 }
   0xc   :  { %p528_p3 = scmp.ne.s32.totalorder %s37_s25, %s527_s12  ;;  %p533_p5 = scmp.lt.s32.totalorder %s527_s12, %s527_s12 }
   0xe   :  { %p534_p6 = por %p533_p5, %p532_p4 }
  0x10   :  { %p535_p7 = pnand %p534_p6, %p528_p3 }
  0x12   :  { %538 = shalt.err (!%p535_p7)
}
  0x13   :  { %s637_s13 = smov 128   ;;  %s638_s14 = smov 8  }
  0x14   :  { %42 = dma.hbm_to_vmem [thread:$0]  %s794_s2, 768, %s37_s25, [#allocation6], %s637_s13, %s637_s13, %s638_s14  }
  0x15   :  { %s539_s19 = scalar_lea.hbm %s793_s1, 768 }
  0x16   :  { %p540_p8 = scmp.ne.s32.totalorder %s793_s1, %s539_s19  ;;  %p543_p9 = scmp.lt.u32.totalorder %s539_s19, %s793_s1 }
  0x18   :  { %p545_p10 = pnand %p543_p9, %p540_p8 }
  0x1a   :  { %548 = shalt.err (!%p545_p10)
}
  0x1b   :  { %s549_s24 = scalar_lea.vmem %s685_s27, 768  ;;  %p554_p12 = scmp.lt.s32.totalorder %s685_s27, %s685_s27 }
  0x1c   :  { %p550_p11 = scmp.ne.s32.totalorder %s685_s27, %s549_s24  ;;  %p555_p13 = scmp.lt.s32.totalorder %s549_s24, %s549_s24 }
  0x1e   :  { %p556_p0 = por %p555_p13, %p554_p12 }
  0x20   :  { %p557_p1 = pnand %p556_p0, %p550_p11 }
  0x22   :  { %560 = shalt.err (!%p557_p1)
}
  0x23   :  { %30 = dma.hbm_to_vmem [thread:$0]  %s793_s1, 768, %s685_s27, [#allocation3], %s637_s13, %s637_s13, %s638_s14  }
  0x24   :  { %s639_s26 = smov [#allocation7]   ;;  %s561_s8 = scalar_lea.hbm %s797_s5, 128 }
  0x25   :  { %s53_s28 = sshll.u32 %s639_s26, 4  ;;  %p562_p2 = scmp.ne.s32.totalorder %s797_s5, %s561_s8  ;;  %s54_s28 = int_to_ptr.vmem [resolvable:$true] %s53_s28 }
  0x26   :  { %p565_p3 = scmp.lt.u32.totalorder %s561_s8, %s797_s5 }
  0x28   :  { %p567_p4 = pnand %p565_p3, %p562_p2 }
  0x2a   :  { %570 = shalt.err (!%p567_p4)
}
  0x2b   :  { %s571_s15 = scalar_lea.vmem %s54_s28, 128  ;;  %p576_p6 = scmp.lt.s32.totalorder %s54_s28, %s54_s28 }
  0x2c   :  { %p572_p5 = scmp.ne.s32.totalorder %s54_s28, %s571_s15  ;;  %p577_p7 = scmp.lt.s32.totalorder %s571_s15, %s571_s15 }
  0x2e   :  { %p578_p8 = por %p577_p7, %p576_p6 }
  0x30   :  { %p579_p9 = pnand %p578_p8, %p572_p5 }
  0x32   :  { %582 = shalt.err (!%p579_p9)
}
  0x33   :  { %56 = dma.hbm_to_vmem [thread:$0]  %s797_s5, 128, %s54_s28, [#allocation6]  }
  0x34   :  { %627 = dma.done.wait [#allocation3], 768  }
  0x35   :  { %628 = vsyncadd [#allocation3], 4294966528 }
  0x36   :  { %629 = dma.done.wait [#allocation6], 896  }
  0x37   :  { %630 = vsyncadd [#allocation6], 4294966400  ;;  %v640_v0 = vmov 1   ;;  %v641_v1 = vmov 0   ;;  %v207_v2 = vld [vmem:[%s792_s0] sm:$0xff]  ;;  %v72_v3 = vld [vmem:[#allocation5] sm:$0xff]  ;;  %v209_v21 = vlaneseq }
  0x38   :  { %515 = vset.pattern.permute.xlu0 %v640_v0  ;;  %516 = vset.pattern.permute.xlu1 %v641_v1  ;;  %v73_v4 = vld [vmem:[#allocation5 + $0x8] sm:$0xff]  ;;  %v74_v5 = vld [vmem:[#allocation5 + $0x10] sm:$0xff]  ;;  %v75_v6 = vld [vmem:[#allocation5 + $0x18] sm:$0xff]  ;;  %vm78_vm0 = vcmask 392192   ;;  %vm233_vm1 = vcmask 64512   ;;  %v642_v25 = vmov 0.0  }
  0x39   :  { %222 = vperm.xlu0 %515, %v207_v2   ;;  %212 = vperm.xlu1 %516, %v207_v2   ;;  %v208_v7 = vld [vmem:[%s792_s0 + $0x8] sm:$0xff]  ;;  %v491_v8 = vpack.c.bf16 %v73_v4, %v72_v3  ;;  %v66_v9 = vld [vmem:[#allocation2] sm:$0xff]  ;;  %v495_v10 = vpack.c.bf16 %v75_v6, %v74_v5  ;;  %v76_v12 = vld [vmem:[#allocation5 + $0x20] sm:$0xff]  ;;  %v210_v22 = vand.u32 127, %v209_v21  ;;  %s643_s2 = smov [#allocation8]  }
  0x3a   :  { %472 = vmatprep.mubr.msk.f32.mxu0 %vm78_vm0, %v66_v9  ;;  %v232_v11 = vld [vmem:[#allocation7] sm:$0xff]  ;;  %v77_v13 = vld [vmem:[#allocation5 + $0x28] sm:$0xff]  ;;  %v67_v16 = vld [vmem:[#allocation2 + $0x8] sm:$0xff]  ;;  %s403_s25 = sshll.u32 %s643_s2, 4  ;;  %s404_s25 = int_to_ptr.vmem [resolvable:$true] %s403_s25 }
  0x3b   :  { %492 = vmatprep.subr.bf16.mxu0 %v491_v8  ;;  %481 = vmatprep.subr.mxu1 %v232_v11  ;;  %v231_v14 = vld [vmem:[%s796_s4] sm:$0xff]  ;;  %v499_v15 = vpack.c.bf16 %v77_v13, %v76_v12  ;;  %v68_v17 = vld [vmem:[#allocation2 + $0x10] sm:$0xff]  ;;  %v69_v18 = vld [vmem:[#allocation2 + $0x18] sm:$0xff]  ;;  %s583_s26 = scalar_lea.vmem %s404_s25, 768  ;;  %p588_p11 = scmp.lt.s32.totalorder %s404_s25, %s404_s25 }
  0x3c   :  { %494 = vmatpush3.bf16.msra.mxu0 %v491_v8  ;;  %482 = vmatpush3.msra.mxu1 %v232_v11  ;;  %v70_v19 = vld [vmem:[#allocation2 + $0x20] sm:$0xff]  ;;  %v71_v20 = vld [vmem:[#allocation2 + $0x28] sm:$0xff]  ;;  %v194_v38 = vld [vmem:[%s795_s3 + $0x10] sm:$0xff]  ;;  %p584_p10 = scmp.ne.s32.totalorder %s404_s25, %s583_s26  ;;  %p589_p12 = scmp.lt.s32.totalorder %s583_s26, %s583_s26 }
  0x3d   :  { %225 = vperm.xlu0 %515, %v208_v7   ;;  %215 = vperm.xlu1 %516, %v208_v7   ;;  %v193_v32 = vld [vmem:[%s795_s3 + $0x8] sm:$0xff]  ;;  %v192_v33 = vld [vmem:[%s795_s3] sm:$0xff] }
  0x3e   :  { %496 = vmatprep.subr.bf16.mxu0 %v495_v10  ;;  %486 = vmatprep.subr.mxu1 %v231_v14  ;;  %p590_p13 = por %p589_p12, %p588_p11 }
  0x40   :  { %498 = vmatpush3.bf16.msra.mxu0 %v495_v10  ;;  %p591_p0 = pnand %p590_p13, %p584_p10 }
  0x41   :  { %500 = vmatprep.subr.bf16.mxu0 %v499_v15 }
  0x44   :  { %502 = vmatpush3.bf16.msra.mxu0 %v499_v15 }
  0x47   :  { %473 = vmatmul.mubr.msk.f32.vlgmr.msra.gmra.mrb[0].mxu0 %vm78_vm0, %v67_v16 }
  0x48   :  { %475 = vmatprep.mubr.msk.f32.mxu0 %vm78_vm0, %v68_v17 }
  0x4b   :  { %476 = vmatmul.mubr.msk.f32.gmra.mrb[2].mxu0 %vm78_vm0, %v69_v18 }
  0x4c   :  { %478 = vmatprep.mubr.msk.f32.mxu0 %vm78_vm0, %v70_v19 }
  0x4f   :  { %479 = vmatmul.mubr.msk.f32.gmra.mrb[4].mxu0 %vm78_vm0, %v71_v20 }
  0xb8   :  { %v223_v23 = vpop.permute.xlu0 %222  ;;  %v213_v24 = vpop.permute.xlu1 %212 }
  0xb9   :  { %vm227_vm2 = vcmp.eq.s32.totalorder %v223_v23, %v210_v22  ;;  %vm217_vm3 = vcmp.eq.s32.totalorder %v213_v24, %v210_v22 }
  0xba   :  { %v229_v26 = vsel %vm227_vm2, 1.0, %v642_v25  ;;  %v219_v28 = vsel %vm217_vm3, 1.0, %v642_v25 }
  0xbb   :  { %483 = vmatprep.mubr.msk.f32.mxu1 %vm233_vm1, %v229_v26 }
  0xbc   :  { %v226_v27 = vpop.permute.xlu0 %225  ;;  %v216_v30 = vpop.permute.xlu1 %215 }
  0xbd   :  { %vm228_vm4 = vcmp.eq.s32.totalorder %v226_v27, %v210_v22  ;;  %vm218_vm5 = vcmp.eq.s32.totalorder %v216_v30, %v210_v22 }
  0xbe   :  { %v230_v29 = vsel %vm228_vm4, 1.0, %v642_v25  ;;  %v220_v31 = vsel %vm218_vm5, 1.0, %v642_v25 }
  0xbf   :  { %484 = vmatmul.mubr.msk.f32.vlgmr.msra.gmra.mrb[0].mxu1 %vm233_vm1, %v230_v29 }
  0xc0   :  { %487 = vmatpush3.msra.mxu1 %v231_v14  ;;  %488 = vmatprep.mubr.msk.f32.mxu1 %vm233_vm1, %v219_v28 }
  0xc7   :  { %489 = vmatmul.mubr.msk.f32.vlgmr.msra.gmra.mrb[0].mxu1 %vm233_vm1, %v220_v31 }
 0x11a   :  { %v474_v34 = vpop.f32.mrb[0].mxu0 }
 0x11b   :  { %v196_v35 = vadd.f32 %v474_v34, %v193_v32  ;;  %v163_v36 = vpop.f32.mrb[1].mxu0 }
 0x11c   :  { %v195_v37 = vadd.f32 %v192_v33, %v163_v36 }
 0x11d   :  { %202 = vst [vmem:[#allocation8 + $0x8] sm:$0xff] %v196_v35 }
 0x11e   :  { %201 = vst [vmem:[#allocation8] sm:$0xff] %v195_v37  ;;  %v477_v39 = vpop.f32.mrb[2].mxu0 }
 0x11f   :  { %v198_v40 = vadd.f32 %v477_v39, %v192_v33  ;;  %v173_v41 = vpop.f32.mrb[3].mxu0 }
 0x120   :  { %v197_v42 = vadd.f32 %v194_v38, %v173_v41 }
 0x121   :  { %204 = vst [vmem:[#allocation8 + $0x18] sm:$0xff] %v198_v40 }
 0x122   :  { %203 = vst [vmem:[#allocation8 + $0x10] sm:$0xff] %v197_v42  ;;  %v480_v43 = vpop.f32.mrb[4].mxu0 }
 0x123   :  { %v200_v44 = vadd.f32 %v480_v43, %v194_v38  ;;  %v183_v45 = vpop.f32.mrb[5].mxu0 }
 0x124   :  { %v199_v46 = vadd.f32 %v193_v32, %v183_v45 }
 0x125   :  { %206 = vst [vmem:[#allocation8 + $0x28] sm:$0xff] %v200_v44 }
 0x126   :  { %205 = vst [vmem:[#allocation8 + $0x20] sm:$0xff] %v199_v46 }
 0x127   :  { %594 = shalt.err (!%p591_p0)
}
 0x128   :  { %s595_s29 = scalar_lea.hbm %s798_s6, 768 }
 0x129   :  { %p596_p1 = scmp.ne.s32.totalorder %s798_s6, %s595_s29  ;;  %p599_p2 = scmp.lt.u32.totalorder %s595_s29, %s798_s6 }
 0x12b   :  { %p601_p3 = pnand %p599_p2, %p596_p1 }
 0x12d   :  { %604 = shalt.err (!%p601_p3)
}
 0x12e   :  { %409 = dma.vmem_to_hbm [thread:$0]  %s404_s25, 768, %s798_s6, [#allocation4], %s637_s13, %s637_s13, %s638_s14  }
 0x12f   :  { %s644_s15 = smov [#allocation9]  }
 0x130   :  { %s415_s1 = sshll.u32 %s644_s15, 4  ;;  %s416_s1 = int_to_ptr.vmem [resolvable:$true] %s415_s1 }
 0x131   :  { %s605_s27 = scalar_lea.vmem %s416_s1, 256  ;;  %p610_p5 = scmp.lt.s32.totalorder %s416_s1, %s416_s1 }
 0x132   :  { %p606_p4 = scmp.ne.s32.totalorder %s416_s1, %s605_s27  ;;  %p611_p6 = scmp.lt.s32.totalorder %s605_s27, %s605_s27 }
 0x134   :  { %p612_p7 = por %p611_p6, %p610_p5 }
 0x136   :  { %p613_p8 = pnand %p612_p7, %p606_p4 }
 0x19a   :  { %v490_v47 = vpop.f32.mrb[0].mxu1 }
 0x19b   :  { %397 = vst [vmem:[#allocation9 + $0x8] sm:$0xff] %v490_v47  ;;  %v387_v48 = vpop.f32.mrb[1].mxu1 }
 0x19c   :  { %396 = vst [vmem:[#allocation9] sm:$0xff] %v387_v48 }
 0x19d   :  { %616 = shalt.err (!%p613_p8)
}
 0x19e   :  { %s617_s5 = scalar_lea.hbm %s799_s7, 256 }
 0x19f   :  { %p618_p9 = scmp.ne.s32.totalorder %s799_s7, %s617_s5  ;;  %p621_p10 = scmp.lt.u32.totalorder %s617_s5, %s799_s7 }
 0x1a1   :  { %p623_p11 = pnand %p621_p10, %p618_p9 }
 0x1a3   :  { %626 = shalt.err (!%p623_p11)
}
 0x1a4   :  { %421 = dma.vmem_to_hbm [thread:$0]  %s416_s1, 256, %s799_s7, [#allocation10], %s637_s13, %s637_s13, %s638_s14  }
 0x1a5   :  { %631 = dma.done.wait [#allocation4], 768  }
 0x1a6   :  { %632 = vsyncadd [#allocation4], 4294966528 }
 0x1a7   :  { %633 = dma.done.wait [#allocation10], 256  }
 0x1a8   :  { %634 = vsyncadd [#allocation10], 4294967040 }
 0x1a9   :  { %428 = vsyncpa [#allocation3], 1 }
 0x1aa   :  { %429 = vsyncpa [#allocation6], 1 }
 0x1ab   :  { %430 = vsyncpa [#allocation4], 1 }
 0x1ac   :  { %431 = vsyncpa [#allocation10], 1 }

</bundles_post_ra>
